<compile_context>
chip_gen: v5e
topology: v5e:2x2
jax: 0.10.0
libtpu: 0.0.40
codegen_flags: <defaults>
</compile_context>

<pallas_src>
import functools

import jax
import jax.numpy as jnp
from jax.experimental import pallas as pl
from jax.experimental.pallas import tpu as pltpu

LANE = 128                 # vreg lane width
SUB = 8                    # vreg sublane tile
TARGET_ROWS_SUM = 4096     # 2 MiB f32 per input buffer (reduction variant)
TARGET_ROWS_ELEM = 2048    # 1 MiB f32 per buffer (2 in + 1 out, double-buffered)
_VMEM_LIMIT = 40 * 1024 * 1024  # above v5e's 16 MiB default, below v7x physical


def _focal_elementwise(x, t, alpha, gamma, binary_targets):
    """Focal loss math on one f32 tile (matches torch BCEWithLogits + focal)."""
    # Numerically-stable BCEWithLogits: max(x,0) - x*t + log(1 + exp(-|x|))
    e = jnp.exp(-jnp.abs(x))
    bce = jnp.maximum(x, 0.0) - x * t + jnp.log1p(e)
    if binary_targets:
        # Hard {0,1} targets: pt is sigmoid(x) or 1-sigmoid(x); reuse e and a
        # cheap EUP reciprocal instead of a second exp (v7x is EUP-bound).
        s = pl.reciprocal(1.0 + e, approx=True)
        pt = jnp.where((x >= 0.0) == (t >= 0.5), s, 1.0 - s)
    else:
        pt = jnp.exp(-bce)
    # Clamp: soft targets can give pt > 1 by a ULP -> would NaN under power().
    w = jnp.maximum(1.0 - pt, 0.0)
    if gamma == 2.0:
        mod = w * w
    elif gamma == 1.0:
        mod = w
    elif gamma == 0.0:
        mod = jnp.ones_like(w)
    elif float(gamma).is_integer() and 0 < gamma <= 4:
        mod = w
        for _ in range(int(gamma) - 1):
            mod = mod * w
    else:
        mod = jnp.power(w, gamma)
    return alpha * mod * bce


def _focal_sum_kernel(x_ref, t_ref, psum_ref, *, alpha, gamma, binary_targets,
                      n_valid, block_rows, masked):
    """Reduction variant: write an (8, 128) partial sum per grid block."""
    x = x_ref[...].astype(jnp.float32)
    t = t_ref[...].astype(jnp.float32)
    focal = _focal_elementwise(x, t, alpha, gamma, binary_targets)
    if masked:
        # Mask tail / out-of-bounds lanes of the (ragged) last block.
        base = pl.program_id(0) * (block_rows * LANE)
        row = jax.lax.broadcasted_iota(jnp.int32, (block_rows, LANE), 0)
        col = jax.lax.broadcasted_iota(jnp.int32, (block_rows, LANE), 1)
        flat = base + row * LANE + col
        focal = jnp.where(flat < n_valid, focal, 0.0)
    # (block_rows, 128) -> (block_rows//8, 8, 128) -> elementwise vreg adds.
    psum_ref[...] = jnp.sum(focal.reshape(-1, SUB, LANE), axis=0)[None, :, :]


def _focal_elem_kernel(x_ref, t_ref, o_ref, *, alpha, gamma, binary_targets):
    """'none' variant: per-element focal loss, stored in the output dtype."""
    x = x_ref[...].astype(jnp.float32)
    t = t_ref[...].astype(jnp.float32)
    focal = _focal_elementwise(x, t, alpha, gamma, binary_targets)
    o_ref[...] = focal.astype(o_ref.dtype)


def focal_loss(inputs, targets, alpha=0.25, gamma=2.0, reduction="mean",
               binary_targets=False):
    """JAX/Pallas equivalent of FocalLoss.forward."""
    orig_shape = inputs.shape
    orig_dtype = inputs.dtype
    n = int(inputs.size)

    if n == 0:  # degenerate edge case, mirrors torch semantics
        if reduction == "sum":
            return jnp.zeros((), orig_dtype)
        if reduction == "mean":
            return jnp.full((), jnp.nan, orig_dtype)
        return jnp.zeros(orig_shape, orig_dtype)

    x_flat = inputs.reshape(-1)
    t_flat = targets.reshape(-1)

    if n % LANE == 0:
        # Fast path: free metadata reshape, no HBM copy of either input.
        rows = n // LANE
        x2 = x_flat.reshape(rows, LANE)
        t2 = t_flat.reshape(rows, LANE)
        padded = False
    else:
        # Fallback: minimal pad to the next lane multiple (pad value masked /
        # sliced off, so its value is irrelevant).
        rows = -(-n // LANE)
        pad = rows * LANE - n
        x2 = jnp.pad(x_flat, (0, pad)).reshape(rows, LANE)
        t2 = jnp.pad(t_flat, (0, pad)).reshape(rows, LANE)
        padded = True

    alpha_f, gamma_f = float(alpha), float(gamma)
    compiler_params = pltpu.CompilerParams(
        dimension_semantics=("parallel",),   # independent blocks -> megacore OK
        vmem_limit_bytes=_VMEM_LIMIT,
    )

    if reduction in ("mean", "sum"):
        block_rows = min(TARGET_ROWS_SUM, ((rows + SUB - 1) // SUB) * SUB)
        num_blocks = -(-rows // block_rows)
        covered = num_blocks * block_rows * LANE
        masked = covered > n  # ragged last block and/or padded tail
        kern = functools.partial(
            _focal_sum_kernel, alpha=alpha_f, gamma=gamma_f,
            binary_targets=binary_targets, n_valid=n,
            block_rows=block_rows, masked=masked)
        in_spec = pl.BlockSpec((block_rows, LANE), lambda i: (i, 0))
        partials = pl.pallas_call(
            kern,
            out_shape=jax.ShapeDtypeStruct((num_blocks, SUB, LANE), jnp.float32),
            grid_spec=pltpu.PrefetchScalarGridSpec(
                num_scalar_prefetch=0,
                grid=(num_blocks,),
                in_specs=[in_spec, in_spec],
                out_specs=pl.BlockSpec((1, SUB, LANE), lambda i: (i, 0, 0)),
            ),
            compiler_params=compiler_params,
        )(x2, t2)
        total = jnp.sum(partials)
        if reduction == "mean":
            total = total / jnp.float32(n)
        return total.astype(orig_dtype)

    # reduction == 'none': per-element output, written in the input dtype.
    block_rows = min(TARGET_ROWS_ELEM, ((rows + SUB - 1) // SUB) * SUB)
    num_blocks = -(-rows // block_rows)
    kern = functools.partial(
        _focal_elem_kernel, alpha=alpha_f, gamma=gamma_f,
        binary_targets=binary_targets)
    in_spec = pl.BlockSpec((block_rows, LANE), lambda i: (i, 0))
    elem = pl.pallas_call(
        kern,
        out_shape=jax.ShapeDtypeStruct((rows, LANE), orig_dtype),
        grid_spec=pltpu.PrefetchScalarGridSpec(
            num_scalar_prefetch=0,
            grid=(num_blocks,),
            in_specs=[in_spec, in_spec],
            out_specs=pl.BlockSpec((block_rows, LANE), lambda i: (i, 0)),
        ),
        compiler_params=compiler_params,
    )(x2, t2)
    if not padded:
        return elem.reshape(orig_shape)           # free metadata reshape
    return elem.reshape(-1)[:n].reshape(orig_shape)


def _focal_loss_ref(inputs, targets, alpha=0.25, gamma=2.0, reduction="mean"):
    """Plain-JAX reference (mirror of the PyTorch module) for validation."""
    x = inputs.astype(jnp.float32)
    t = targets.astype(jnp.float32)
    bce = jnp.maximum(x, 0.0) - x * t + jnp.log1p(jnp.exp(-jnp.abs(x)))
    pt = jnp.exp(-bce)
    focal = alpha * (1.0 - pt) ** gamma * bce
    if reduction == "mean":
        return focal.mean()
    elif reduction == "sum":
        return focal.sum()
    return focal


if __name__ == "__main__":
    key = jax.random.PRNGKey(0)
    k_x, k_t, k_x2, k_t2 = jax.random.split(key, 4)

    # Dense-detection style logits/targets, NCHW [batch=2, anchors*cls=4, 16, 16]
    inputs = jax.random.normal(k_x, (2, 4, 16, 16), dtype=jnp.float32)
    targets = jax.random.bernoulli(k_t, p=0.3, shape=(2, 4, 16, 16)).astype(jnp.float32)

    # mean (aligned fast path, exact soft-target math)
    out = jax.block_until_ready(focal_loss(inputs, targets, reduction="mean"))
    ref = _focal_loss_ref(inputs, targets, reduction="mean")
    assert jnp.allclose(out, ref, rtol=1e-5, atol=1e-5), (out, ref)

    # sum
    out_sum = jax.block_until_ready(focal_loss(inputs, targets, reduction="sum"))
    ref_sum = _focal_loss_ref(inputs, targets, reduction="sum")
    assert jnp.allclose(out_sum, ref_sum, rtol=1e-5, atol=1e-5), (out_sum, ref_sum)

    # none (output dtype == input dtype, no wrapper slice/cast on aligned shapes)
    elem = jax.block_until_ready(focal_loss(inputs, targets, reduction="none"))
    elem_ref = _focal_loss_ref(inputs, targets, reduction="none")
    assert elem.shape == inputs.shape and elem.dtype == inputs.dtype
    assert jnp.allclose(elem, elem_ref, rtol=1e-5, atol=1e-6)

    # binary-target fast path (one fewer exp per element; approx reciprocal)
    out_bin = jax.block_until_ready(
        focal_loss(inputs, targets, reduction="mean", binary_targets=True))
    assert jnp.allclose(out_bin, ref, rtol=2e-2, atol=1e-4), (out_bin, ref)

    # Unaligned shape exercises the fallback pad + in-kernel tail masking.
    inputs_u = jax.random.normal(k_x2, (3, 5, 7), dtype=jnp.float32)
    targets_u = jax.random.bernoulli(k_t2, p=0.3, shape=(3, 5, 7)).astype(jnp.float32)
    out_u = jax.block_until_ready(focal_loss(inputs_u, targets_u, reduction="mean"))
    ref_u = _focal_loss_ref(inputs_u, targets_u, reduction="mean")
    assert jnp.allclose(out_u, ref_u, rtol=1e-5, atol=1e-5), (out_u, ref_u)
    elem_u = jax.block_until_ready(focal_loss(inputs_u, targets_u, reduction="none"))
    elem_u_ref = _focal_loss_ref(inputs_u, targets_u, reduction="none")
    assert elem_u.shape == inputs_u.shape
    assert jnp.allclose(elem_u, elem_u_ref, rtol=1e-5, atol=1e-6)

    print("KERNEL_OK")
</pallas_src>

<mosaic_0001>
module attributes {stable_mosaic.version = 11 : i64} {
  func.func @_focal_sum_kernel(%arg0: i32, %arg1: memref<16x128xf32, #tpu.memory_space<vmem>>, %arg2: memref<16x128xf32, #tpu.memory_space<vmem>>, %arg3: memref<1x8x128xf32, #tpu.memory_space<vmem>>) attributes {dimension_semantics = [#tpu.dimension_semantics<parallel>], iteration_bounds = array<i64: 1>, scalar_prefetch = 0 : i64, scratch_operands = 0 : i64, tpu.core_type = #tpu.core_type<tc>, window_params = [{transform_indices = @transform_0, window_bounds = array<i64: 16, 128>}, {transform_indices = @transform_1, window_bounds = array<i64: 16, 128>}, {transform_indices = @transform_2, window_bounds = array<i64: 1, 8, 128>}]} {
    %c0 = arith.constant 0 : index
    %c0_0 = arith.constant 0 : index
    %0 = vector.load %arg1[%c0, %c0_0] : memref<16x128xf32, #tpu.memory_space<vmem>>, vector<16x128xf32>
    %c0_1 = arith.constant 0 : index
    %c0_2 = arith.constant 0 : index
    %1 = vector.load %arg2[%c0_1, %c0_2] : memref<16x128xf32, #tpu.memory_space<vmem>>, vector<16x128xf32>
    %2 = math.absf %0 : vector<16x128xf32>
    %cst = arith.constant 0.000000e+00 : f32
    %3 = vector.broadcast %cst : f32 to vector<16x128xf32>
    %4 = arith.subf %3, %2 : vector<16x128xf32>
    %5 = math.exp %4 : vector<16x128xf32>
    %cst_3 = arith.constant 0.000000e+00 : f32
    %6 = vector.broadcast %cst_3 : f32 to vector<16x128xf32>
    %7 = arith.maximumf %0, %6 : vector<16x128xf32>
    %8 = arith.mulf %0, %1 : vector<16x128xf32>
    %9 = arith.subf %7, %8 : vector<16x128xf32>
    %10 = math.log1p %5 : vector<16x128xf32>
    %11 = arith.addf %9, %10 : vector<16x128xf32>
    %cst_4 = arith.constant 0.000000e+00 : f32
    %12 = vector.broadcast %cst_4 : f32 to vector<16x128xf32>
    %13 = arith.subf %12, %11 : vector<16x128xf32>
    %14 = math.exp %13 : vector<16x128xf32>
    %cst_5 = arith.constant 1.000000e+00 : f32
    %15 = vector.broadcast %cst_5 : f32 to vector<16x128xf32>
    %16 = arith.subf %15, %14 : vector<16x128xf32>
    %cst_6 = arith.constant 0.000000e+00 : f32
    %17 = vector.broadcast %cst_6 : f32 to vector<16x128xf32>
    %18 = arith.maximumf %16, %17 : vector<16x128xf32>
    %19 = arith.mulf %18, %18 : vector<16x128xf32>
    %cst_7 = arith.constant 2.500000e-01 : f32
    %20 = vector.broadcast %cst_7 : f32 to vector<16x128xf32>
    %21 = arith.mulf %20, %19 : vector<16x128xf32>
    %22 = arith.mulf %21, %11 : vector<16x128xf32>
    %23 = vector.shape_cast %22 : vector<16x128xf32> to vector<2x8x128xf32>
    %cst_8 = arith.constant dense<0.000000e+00> : vector<8x128xf32>
    %24 = vector.multi_reduction <add>, %23, %cst_8 [0] : vector<2x8x128xf32> to vector<8x128xf32>
    %25 = vector.shape_cast %24 : vector<8x128xf32> to vector<1x8x128xf32>
    %c0_9 = arith.constant 0 : index
    %c0_10 = arith.constant 0 : index
    %c0_11 = arith.constant 0 : index
    %26 = vector.load %arg3[%c0_9, %c0_10, %c0_11] : memref<1x8x128xf32, #tpu.memory_space<vmem>>, vector<1x8x128xf32>
    tpu.vector_store %arg3[%c0_9, %c0_10, %c0_11], %25 {strides = array<i32>} : memref<1x8x128xf32, #tpu.memory_space<vmem>>, vector<1x8x128xf32>,
    return
  }
  func.func @transform_0(%arg0: i32) -> (i32, i32) {
    %c0_i32 = arith.constant 0 : i32
    %c0_i32_0 = arith.constant 0 : i32
    return %arg0, %c0_i32 : i32, i32
  }
  func.func @transform_1(%arg0: i32) -> (i32, i32) {
    %c0_i32 = arith.constant 0 : i32
    %c0_i32_0 = arith.constant 0 : i32
    return %arg0, %c0_i32 : i32, i32
  }
  func.func @transform_2(%arg0: i32) -> (i32, i32, i32) {
    %c0_i32 = arith.constant 0 : i32
    %c0_i32_0 = arith.constant 0 : i32
    %c0_i32_1 = arith.constant 0 : i32
    return %arg0, %c0_i32, %c0_i32_0 : i32, i32, i32
  }
}

</mosaic_0001>

<bundles_post_ra>
// kernel: tpu_custom_call.1
= control target key start
LH: loop header
LB: loop body
LE: loop exit
PB: predicated region body
PF: predicated region fallthrough
CT: control target
= control target key end

     0   :  { %7 = vsyncpa [#allocation3], 0  ;;  %s242_s0 = inlined_call_operand.hbm [shape: f32[16,128], index: 0, kind: input, shape index: {}]   ;;  %s243_s1 = inlined_call_operand.hbm [shape: f32[16,128], index: 1, kind: input, shape index: {}]   ;;  %s244_s2 = inlined_call_operand.hbm [shape: f32[1,8,128], index: 2, kind: output, shape index: {}]  }
   0x1   :  { %8 = vsyncpa [#allocation6], 0 }
   0x2   :  { %9 = vsyncpa [#allocation4], 0  ;;  %s14_s11 = sshll.u32 %s242_s0, 4  ;;  %s213_s12 = smov [#allocation2]   ;;  %s15_s11 = int_to_ptr.hbm [resolvable:$true] %s14_s11 }
   0x3   :  { %s16_s13 = sshll.u32 %s213_s12, 4  ;;  %s27_s16 = sshll.u32 %s243_s1, 4  ;;  %s17_s13 = int_to_ptr.vmem [resolvable:$true] %s16_s13  ;;  %s28_s16 = int_to_ptr.hbm [resolvable:$true] %s27_s16 }
   0x4   :  { %s214_s17 = smov 128   ;;  %s215_s18 = smov 8  }
   0x5   :  { %22 = dma.hbm_to_vmem [thread:$0]  %s15_s11, 256, %s17_s13, [#allocation3], %s214_s17, %s214_s17, %s215_s18  }
   0x6   :  { %s216_s19 = smov [#allocation5]  }
   0x7   :  { %s29_s20 = sshll.u32 %s216_s19, 4  ;;  %s30_s20 = int_to_ptr.vmem [resolvable:$true] %s29_s20 }
   0x8   :  { %35 = dma.hbm_to_vmem [thread:$0]  %s28_s16, 256, %s30_s20, [#allocation6], %s214_s17, %s214_s17, %s215_s18  }
   0x9   :  { %207 = dma.done.wait [#allocation3], 256  }
   0xa   :  { %208 = vsyncadd [#allocation3], 4294967040 }
   0xb   :  { %209 = dma.done.wait [#allocation6], 256  }
   0xc   :  { %210 = vsyncadd [#allocation6], 4294967040  ;;  %v44_v0 = vld [vmem:[#allocation2] sm:$0xff]  ;;  %v45_v1 = vld [vmem:[#allocation2 + $0x8] sm:$0xff]  ;;  %s217_s0 = smov [#allocation7]   ;;  %s107_s23 = sshll.u32 %s244_s2, 4  ;;  %s108_s23 = int_to_ptr.hbm [resolvable:$true] %s107_s23 }
   0xd   :  { %v48_v2 = vand.u32 2147483647, %v44_v0  ;;  %v49_v3 = vand.u32 2147483647, %v45_v1  ;;  %v46_v12 = vld [vmem:[#allocation5] sm:$0xff]  ;;  %v47_v15 = vld [vmem:[#allocation5 + $0x8] sm:$0xff] }
   0xe   :  { %v56_v17 = vmax.f32 %v44_v0, 0.0  ;;  %v58_v18 = vmul.f32 %v46_v12, %v44_v0  ;;  %v57_v21 = vmax.f32 %v45_v1, 0.0  ;;  %v59_v22 = vmul.f32 %v47_v15, %v45_v1  ;;  %s105_s1 = sshll.u32 %s217_s0, 4  ;;  %s106_s1 = int_to_ptr.vmem [resolvable:$true] %s105_s1 }
   0xf   :  { %v50_v4 = vsub.f32 0.0, %v48_v2  ;;  %v51_v5 = vsub.f32 0.0, %v49_v3 }
  0x10   :  { %v60_v26 = vsub.f32 %v56_v17, %v58_v18  ;;  %v61_v29 = vsub.f32 %v57_v21, %v59_v22 }
  0x11   :  { %v52_v6 = vmul.f32 1.442695, %v50_v4  ;;  %v54_v7 = vmul.f32 1.442695, %v51_v5 }
  0x13   :  { %123 = vpow2.f32 %v52_v6 }
  0x14   :  { %125 = vpow2.f32 %v54_v7 }
  0x19   :  { %v124_v8 = vpop.eup %123 }
  0x1a   :  { %v126_v9 = vpop.eup %125  ;;  %v62_v10 = vadd.f32 1.0, %v124_v8  ;;  %v65_v11 = vmul.f32 -0.5, %v124_v8  ;;  %v68_v19 = vand.u32 2147483647, %v124_v8 }
  0x1b   :  { %v71_v13 = vadd.f32 1.0, %v126_v9  ;;  %v74_v14 = vmul.f32 -0.5, %v126_v9  ;;  %v77_v23 = vand.u32 2147483647, %v126_v9 }
  0x1c   :  { %127 = vlog2.f32 %v62_v10  ;;  %v66_v16 = vadd.f32 1.0, %v65_v11  ;;  %vm69_vm0 = vcmp.lt.f32.partialorder %v68_v19, 0.0004427343 }
  0x1d   :  { %129 = vlog2.f32 %v71_v13  ;;  %v75_v20 = vadd.f32 1.0, %v74_v14  ;;  %vm78_vm1 = vcmp.lt.f32.partialorder %v77_v23, 0.0004427343 }
  0x1e   :  { %v67_v24 = vmul.f32 %v124_v8, %v66_v16 }
  0x1f   :  { %v76_v27 = vmul.f32 %v126_v9, %v75_v20 }
  0x22   :  { %v128_v25 = vpop.eup %127 }
  0x23   :  { %v130_v28 = vpop.eup %129  ;;  %v64_v30 = vmul.f32 0.6931472, %v128_v25 }
  0x24   :  { %v73_v31 = vmul.f32 0.6931472, %v130_v28 }
  0x25   :  { %v70_v32 = vsel %vm69_vm0, %v67_v24, %v64_v30 }
  0x26   :  { %v79_v33 = vsel %vm78_vm1, %v76_v27, %v73_v31  ;;  %v80_v34 = vadd.f32 %v70_v32, %v60_v26 }
  0x27   :  { %v81_v35 = vadd.f32 %v79_v33, %v61_v29 }
  0x28   :  { %v82_v36 = vsub.f32 0.0, %v80_v34 }
  0x29   :  { %v83_v37 = vsub.f32 0.0, %v81_v35 }
  0x2a   :  { %v84_v38 = vmul.f32 1.442695, %v82_v36 }
  0x2b   :  { %v86_v39 = vmul.f32 1.442695, %v83_v37 }
  0x2c   :  { %131 = vpow2.f32 %v84_v38 }
  0x2d   :  { %133 = vpow2.f32 %v86_v39 }
  0x32   :  { %v132_v40 = vpop.eup %131 }
  0x33   :  { %v134_v41 = vpop.eup %133  ;;  %v88_v42 = vsub.f32 1.0, %v132_v40 }
  0x34   :  { %v89_v43 = vsub.f32 1.0, %v134_v41 }
  0x35   :  { %v90_v44 = vmax.f32 %v88_v42, 0.0 }
  0x36   :  { %v91_v45 = vmax.f32 %v89_v43, 0.0 }
  0x37   :  { %v92_v46 = vmul.f32 %v90_v44, %v90_v44 }
  0x38   :  { %v93_v47 = vmul.f32 %v91_v45, %v91_v45 }
  0x39   :  { %v94_v48 = vmul.f32 0.25, %v92_v46 }
  0x3a   :  { %v95_v49 = vmul.f32 0.25, %v93_v47 }
  0x3b   :  { %v96_v50 = vmul.f32 %v94_v48, %v80_v34 }
  0x3c   :  { %v97_v51 = vmul.f32 %v95_v49, %v81_v35 }
  0x3e   :  { %v98_v52 = vadd.f32 %v97_v51, %v96_v50 }
  0x40   :  { %99 = vst [vmem:[#allocation7] sm:$0xff] %v98_v52 }
  0x41   :  { %110 = dma.vmem_to_hbm [thread:$0]  %s106_s1, 128, %s108_s23, [#allocation4]  }
  0x42   :  { %211 = dma.done.wait [#allocation4], 128  }
  0x43   :  { %212 = vsyncadd [#allocation4], 4294967168 }
  0x44   :  { %115 = vsyncpa [#allocation3], 1 }
  0x45   :  { %116 = vsyncpa [#allocation6], 1 }
  0x46   :  { %117 = vsyncpa [#allocation4], 1 }

</bundles_post_ra>
